<compile_context>
chip_gen: v6e
topology: v6e:2x2x1
jax: 0.10.0
libtpu: 0.0.40
codegen_flags: <defaults>
</compile_context>

<pallas_src>
import functools
import math

import jax
import jax.numpy as jnp
from jax import lax
from jax.experimental import pallas as pl
from jax.experimental.pallas import tpu as pltpu

# Large finite negative: exp(MASK - m) underflows to exactly 0.0 in f32, so
# masked positions contribute exactly nothing (same as -inf masking).
_MASK_VALUE = -1e30


# ---------------------------------------------------------------------------
# One-time weight preparation (hoisted out of the per-call path).
# ---------------------------------------------------------------------------
def prepare_qkv_weights(wq, wk, wv):
    """Fold the 1/sqrt(A) score scale into Wq; no per-call weight work."""
    atten_dim = wq.shape[1]
    scale = jnp.asarray(1.0 / math.sqrt(atten_dim), dtype=wq.dtype)
    return wq * scale, wk, wv


# ---------------------------------------------------------------------------
# Pass 1: fused QKV projection (row-tiled matmuls; weights stay resident).
# ---------------------------------------------------------------------------
def _qkv_projection_kernel(x_ref, wq_ref, wk_ref, wv_ref, q_ref, k_ref, v_ref):
    x = x_ref[...]  # keep native dtype (bf16 stays bf16 -> bf16 MXU path)
    q_ref[...] = jnp.dot(x, wq_ref[...],
                         preferred_element_type=jnp.float32).astype(q_ref.dtype)
    k_ref[...] = jnp.dot(x, wk_ref[...],
                         preferred_element_type=jnp.float32).astype(k_ref.dtype)
    v_ref[...] = jnp.dot(x, wv_ref[...],
                         preferred_element_type=jnp.float32).astype(v_ref.dtype)


def _qkv_projection(x2d, wq, wk, wv, *, row_tile):
    n_rows, embed_dim = x2d.shape
    atten_dim = wq.shape[1]
    grid = (n_rows // row_tile,)
    out_sds = jax.ShapeDtypeStruct((n_rows, atten_dim), x2d.dtype)
    return pl.pallas_call(
        _qkv_projection_kernel,
        out_shape=[out_sds, out_sds, out_sds],
        grid=grid,
        in_specs=[
            pl.BlockSpec((row_tile, embed_dim), lambda i: (i, 0)),
            pl.BlockSpec((embed_dim, atten_dim), lambda i: (0, 0)),
            pl.BlockSpec((embed_dim, atten_dim), lambda i: (0, 0)),
            pl.BlockSpec((embed_dim, atten_dim), lambda i: (0, 0)),
        ],
        out_specs=[
            pl.BlockSpec((row_tile, atten_dim), lambda i: (i, 0)),
            pl.BlockSpec((row_tile, atten_dim), lambda i: (i, 0)),
            pl.BlockSpec((row_tile, atten_dim), lambda i: (i, 0)),
        ],
        compiler_params=pltpu.CompilerParams(
            dimension_semantics=("parallel",)),
    )(x2d, wq, wk, wv)


# ---------------------------------------------------------------------------
# Pass 2: causal flash attention, grid = (B, S//tq, S//tk), online softmax.
# ---------------------------------------------------------------------------
def _flash_attention_kernel(q_ref, k_ref, v_ref, o_ref, m_sc, l_sc, acc_sc,
                            *, tq, tk):
    qi = pl.program_id(1)
    ki = pl.program_id(2)

    @pl.when(ki == 0)
    def _():
        m_sc[...] = jnp.full_like(m_sc, -jnp.inf)
        l_sc[...] = jnp.zeros_like(l_sc)
        acc_sc[...] = jnp.zeros_like(acc_sc)

    q_start = qi * tq
    kv_start = ki * tk

    # Skip kv tiles strictly above the diagonal: no QK^T / exp / PV issued.
    @pl.when(kv_start <= q_start + (tq - 1))
    def _():
        # q is already pre-scaled by 1/sqrt(A) (folded into Wq).
        # Contract the last dims directly (no explicit k transpose).
        s = lax.dot_general(
            q_ref[...], k_ref[...],
            dimension_numbers=(((1,), (1,)), ((), ())),
            preferred_element_type=jnp.float32)                    # (tq, tk)

        # Tile-local causal mask (only "bites" on diagonal-crossing tiles;
        # below-diagonal tiles pass through unchanged).
        row = q_start + lax.broadcasted_iota(jnp.int32, (tq, tk), 0)
        col = kv_start + lax.broadcasted_iota(jnp.int32, (tq, tk), 1)
        s = jnp.where(col <= row, s, _MASK_VALUE)

        # Online softmax update (all statistics in f32).
        m_prev = m_sc[...]
        m_new = jnp.maximum(m_prev, jnp.max(s, axis=-1, keepdims=True))
        alpha = jnp.exp(m_prev - m_new)
        p = jnp.exp(s - m_new)
        l_sc[...] = alpha * l_sc[...] + jnp.sum(p, axis=-1, keepdims=True)
        acc_sc[...] = alpha * acc_sc[...] + jnp.dot(
            p.astype(v_ref.dtype), v_ref[...],
            preferred_element_type=jnp.float32)
        m_sc[...] = m_new

    @pl.when(ki == pl.num_programs(2) - 1)
    def _():
        # Exact reciprocal (approx=True would break the 1e-5 tolerance).
        o_ref[...] = (acc_sc[...] * pl.reciprocal(l_sc[...])).astype(o_ref.dtype)


def _flash_attention(q, k, v, *, tq, tk):
    batch, seq, atten_dim = q.shape
    grid = (batch, seq // tq, seq // tk)
    kernel = functools.partial(_flash_attention_kernel, tq=tq, tk=tk)
    return pl.pallas_call(
        kernel,
        out_shape=jax.ShapeDtypeStruct((batch, seq, atten_dim), q.dtype),
        grid=grid,
        in_specs=[
            pl.BlockSpec((None, tq, atten_dim), lambda b, qi, ki: (b, qi, 0)),
            pl.BlockSpec((None, tk, atten_dim), lambda b, qi, ki: (b, ki, 0)),
            pl.BlockSpec((None, tk, atten_dim), lambda b, qi, ki: (b, ki, 0)),
        ],
        out_specs=pl.BlockSpec((None, tq, atten_dim),
                               lambda b, qi, ki: (b, qi, 0)),
        scratch_shapes=[
            pltpu.VMEM((tq, 1), jnp.float32),          # running max m
            pltpu.VMEM((tq, 1), jnp.float32),          # running denom l
            pltpu.VMEM((tq, atten_dim), jnp.float32),  # unnormalized acc
        ],
        compiler_params=pltpu.CompilerParams(
            dimension_semantics=("parallel", "parallel", "arbitrary")),
    )(q, k, v)


# ---------------------------------------------------------------------------
# Forward wrapper (expects weights from prepare_qkv_weights).
# ---------------------------------------------------------------------------
def _pick_tile(n, target):
    """Largest tile <= target that divides n and is a multiple of 8 (else n)."""
    if n <= target:
        return n
    for t in range(min(n, target), 7, -1):
        if n % t == 0 and t % 8 == 0:
            return t
    return n


def masked_self_attention(x, wq_scaled, wk, wv, *, q_tile=128, kv_tile=128):
    batch, seq, embed_dim = x.shape
    atten_dim = wq_scaled.shape[1]
    n_rows = batch * seq

    row_tile = _pick_tile(n_rows, 256)
    tq = _pick_tile(seq, q_tile)
    tk = _pick_tile(seq, kv_tile)

    # Pass 1: QKV projection on the flattened (B*S, E) rows.
    q2d, k2d, v2d = _qkv_projection(
        x.reshape(n_rows, embed_dim), wq_scaled, wk, wv, row_tile=row_tile)
    q = q2d.reshape(batch, seq, atten_dim)
    k = k2d.reshape(batch, seq, atten_dim)
    v = v2d.reshape(batch, seq, atten_dim)

    # Pass 2: per-batch causal flash attention.
    return _flash_attention(q, k, v, tq=tq, tk=tk)


# ---------------------------------------------------------------------------
# Pure-JAX reference (mirrors the PyTorch module).
# ---------------------------------------------------------------------------
def reference(x, wq, wk, wv):
    q = x @ wq
    k = x @ wk
    v = x @ wv
    atten_dim = k.shape[-1]
    seq = x.shape[1]
    scores = jnp.einsum("bsd,btd->bst", q, k) / (atten_dim ** 0.5)
    tril = jnp.tril(jnp.ones((seq, seq), dtype=jnp.float32))
    scores = jnp.where(tril == 0, -jnp.inf, scores)
    attn = jax.nn.softmax(scores, axis=-1)
    return jnp.einsum("bst,btd->bsd", attn, v)


if __name__ == "__main__":
    key = jax.random.PRNGKey(0)
    kx, kq, kk, kv, kx2 = jax.random.split(key, 5)

    B, S, E, A = 2, 8, 32, 16
    x = jax.random.normal(kx, (B, S, E), dtype=jnp.float32)

    # Deterministic init mimicking nn.Linear default: U(-1/sqrt(E), 1/sqrt(E)).
    bound = 1.0 / math.sqrt(E)
    wq = jax.random.uniform(kq, (E, A), minval=-bound, maxval=bound,
                            dtype=jnp.float32)
    wk = jax.random.uniform(kk, (E, A), minval=-bound, maxval=bound,
                            dtype=jnp.float32)
    wv = jax.random.uniform(kv, (E, A), minval=-bound, maxval=bound,
                            dtype=jnp.float32)

    wq_s, wk_p, wv_p = prepare_qkv_weights(wq, wk, wv)

    # Small shape (single tile per batch element).
    out = masked_self_attention(x, wq_s, wk_p, wv_p)
    out = jax.block_until_ready(out)
    ref = reference(x, wq, wk, wv)
    assert out.shape == (B, S, A)
    assert jnp.allclose(out, ref, atol=1e-5, rtol=1e-5), "mismatch vs reference"

    # Larger sequence: exercises multi-tile online softmax, the causal-tile
    # skip, and the diagonal-tile mask path.
    S2 = 256
    x2 = jax.random.normal(kx2, (B, S2, E), dtype=jnp.float32)
    out2 = masked_self_attention(x2, wq_s, wk_p, wv_p)
    out2 = jax.block_until_ready(out2)
    ref2 = reference(x2, wq, wk, wv)
    assert out2.shape == (B, S2, A)
    assert jnp.allclose(out2, ref2, atol=1e-5, rtol=1e-5), "tiled mismatch"

    print("KERNEL_OK")
</pallas_src>

<mosaic_0001>
module attributes {stable_mosaic.version = 11 : i64} {
  func.func @_qkv_projection_kernel(%arg0: i32, %arg1: memref<16x32xf32, #tpu.memory_space<vmem>>, %arg2: memref<32x16xf32, #tpu.memory_space<vmem>>, %arg3: memref<32x16xf32, #tpu.memory_space<vmem>>, %arg4: memref<32x16xf32, #tpu.memory_space<vmem>>, %arg5: memref<16x16xf32, #tpu.memory_space<vmem>>, %arg6: memref<16x16xf32, #tpu.memory_space<vmem>>, %arg7: memref<16x16xf32, #tpu.memory_space<vmem>>) attributes {dimension_semantics = [#tpu.dimension_semantics<parallel>], iteration_bounds = array<i64: 1>, scalar_prefetch = 0 : i64, scratch_operands = 0 : i64, tpu.core_type = #tpu.core_type<tc>, window_params = [{transform_indices = @transform_0, window_bounds = array<i64: 16, 32>}, {pipeline_mode = #tpu.pipeline_mode<synchronous>, transform_indices = @transform_1, window_bounds = array<i64: 32, 16>}, {pipeline_mode = #tpu.pipeline_mode<synchronous>, transform_indices = @transform_2, window_bounds = array<i64: 32, 16>}, {pipeline_mode = #tpu.pipeline_mode<synchronous>, transform_indices = @transform_3, window_bounds = array<i64: 32, 16>}, {transform_indices = @transform_4, window_bounds = array<i64: 16, 16>}, {transform_indices = @transform_5, window_bounds = array<i64: 16, 16>}, {transform_indices = @transform_6, window_bounds = array<i64: 16, 16>}]} {
    %c0 = arith.constant 0 : index
    %c0_0 = arith.constant 0 : index
    %0 = vector.load %arg1[%c0, %c0_0] : memref<16x32xf32, #tpu.memory_space<vmem>>, vector<16x32xf32>
    %c0_1 = arith.constant 0 : index
    %c0_2 = arith.constant 0 : index
    %1 = vector.load %arg2[%c0_1, %c0_2] : memref<32x16xf32, #tpu.memory_space<vmem>>, vector<32x16xf32>
    %cst = arith.constant dense<0.000000e+00> : vector<16x16xf32>
    %2 = tpu.matmul %0, %1, %cst {dimension_numbers = #tpu.dot_dimension_numbers<[1], [0], [0], [1], [0, 0, 1, 1], [], []>} : vector<16x32xf32>, vector<32x16xf32>, vector<16x16xf32> -> vector<16x16xf32>
    %c0_3 = arith.constant 0 : index
    %c0_4 = arith.constant 0 : index
    %3 = vector.load %arg5[%c0_3, %c0_4] : memref<16x16xf32, #tpu.memory_space<vmem>>, vector<16x16xf32>
    tpu.vector_store %arg5[%c0_3, %c0_4], %2 {strides = array<i32>} : memref<16x16xf32, #tpu.memory_space<vmem>>, vector<16x16xf32>,
    %c0_5 = arith.constant 0 : index
    %c0_6 = arith.constant 0 : index
    %4 = vector.load %arg3[%c0_5, %c0_6] : memref<32x16xf32, #tpu.memory_space<vmem>>, vector<32x16xf32>
    %cst_7 = arith.constant dense<0.000000e+00> : vector<16x16xf32>
    %5 = tpu.matmul %0, %4, %cst_7 {dimension_numbers = #tpu.dot_dimension_numbers<[1], [0], [0], [1], [0, 0, 1, 1], [], []>} : vector<16x32xf32>, vector<32x16xf32>, vector<16x16xf32> -> vector<16x16xf32>
    %c0_8 = arith.constant 0 : index
    %c0_9 = arith.constant 0 : index
    %6 = vector.load %arg6[%c0_8, %c0_9] : memref<16x16xf32, #tpu.memory_space<vmem>>, vector<16x16xf32>
    tpu.vector_store %arg6[%c0_8, %c0_9], %5 {strides = array<i32>} : memref<16x16xf32, #tpu.memory_space<vmem>>, vector<16x16xf32>,
    %c0_10 = arith.constant 0 : index
    %c0_11 = arith.constant 0 : index
    %7 = vector.load %arg4[%c0_10, %c0_11] : memref<32x16xf32, #tpu.memory_space<vmem>>, vector<32x16xf32>
    %cst_12 = arith.constant dense<0.000000e+00> : vector<16x16xf32>
    %8 = tpu.matmul %0, %7, %cst_12 {dimension_numbers = #tpu.dot_dimension_numbers<[1], [0], [0], [1], [0, 0, 1, 1], [], []>} : vector<16x32xf32>, vector<32x16xf32>, vector<16x16xf32> -> vector<16x16xf32>
    %c0_13 = arith.constant 0 : index
    %c0_14 = arith.constant 0 : index
    %9 = vector.load %arg7[%c0_13, %c0_14] : memref<16x16xf32, #tpu.memory_space<vmem>>, vector<16x16xf32>
    tpu.vector_store %arg7[%c0_13, %c0_14], %8 {strides = array<i32>} : memref<16x16xf32, #tpu.memory_space<vmem>>, vector<16x16xf32>,
    return
  }
  func.func @transform_0(%arg0: i32) -> (i32, i32) {
    %c0_i32 = arith.constant 0 : i32
    %c0_i32_0 = arith.constant 0 : i32
    return %arg0, %c0_i32 : i32, i32
  }
  func.func @transform_1(%arg0: i32) -> (i32, i32) {
    %c0_i32 = arith.constant 0 : i32
    %c0_i32_0 = arith.constant 0 : i32
    %c0_i32_1 = arith.constant 0 : i32
    return %c0_i32, %c0_i32_0 : i32, i32
  }
  func.func @transform_2(%arg0: i32) -> (i32, i32) {
    %c0_i32 = arith.constant 0 : i32
    %c0_i32_0 = arith.constant 0 : i32
    %c0_i32_1 = arith.constant 0 : i32
    return %c0_i32, %c0_i32_0 : i32, i32
  }
  func.func @transform_3(%arg0: i32) -> (i32, i32) {
    %c0_i32 = arith.constant 0 : i32
    %c0_i32_0 = arith.constant 0 : i32
    %c0_i32_1 = arith.constant 0 : i32
    return %c0_i32, %c0_i32_0 : i32, i32
  }
  func.func @transform_4(%arg0: i32) -> (i32, i32) {
    %c0_i32 = arith.constant 0 : i32
    %c0_i32_0 = arith.constant 0 : i32
    return %arg0, %c0_i32 : i32, i32
  }
  func.func @transform_5(%arg0: i32) -> (i32, i32) {
    %c0_i32 = arith.constant 0 : i32
    %c0_i32_0 = arith.constant 0 : i32
    return %arg0, %c0_i32 : i32, i32
  }
  func.func @transform_6(%arg0: i32) -> (i32, i32) {
    %c0_i32 = arith.constant 0 : i32
    %c0_i32_0 = arith.constant 0 : i32
    return %arg0, %c0_i32 : i32, i32
  }
}

</mosaic_0001>

<bundles_post_ra>
// kernel: tpu_custom_call.1
= control target key start
LH: loop header
LB: loop body
LE: loop exit
PB: predicated region body
PF: predicated region fallthrough
CT: control target
= control target key end

     0   :  { %12 = vsyncpa [#allocation3], 0  ;;  %vm28_vm0 = vcmask 261120   ;;  %s560_s0 = inlined_call_operand.vmem [shape: f32[16,32], index: 0, kind: input, shape index: {}]   ;;  %s561_s1 = inlined_call_operand.vmem [shape: f32[32,16], index: 1, kind: input, shape index: {}]   ;;  %s562_s2 = inlined_call_operand.vmem [shape: f32[32,16], index: 2, kind: input, shape index: {}]   ;;  %s563_s3 = inlined_call_operand.vmem [shape: f32[32,16], index: 3, kind: input, shape index: {}]   ;;  %s564_s4 = inlined_call_operand.hbm [shape: f32[16,16], index: 4, kind: output, shape index: {0}]   ;;  %s565_s5 = inlined_call_operand.hbm [shape: f32[16,16], index: 5, kind: output, shape index: {1}]   ;;  %s566_s6 = inlined_call_operand.hbm [shape: f32[16,16], index: 6, kind: output, shape index: {2}]  }
   0x1   :  { %v27_v0 = vld [vmem:[%s561_s1 + $0x18] sm:$0xff]  ;;  %v26_v1 = vld [vmem:[%s561_s1 + $0x10] sm:$0xff]  ;;  %v22_v3 = vld [vmem:[%s560_s0] sm:$0xff] }
   0x2   :  { %346 = vmatprep.subr.mxu0 %v27_v0  ;;  %v116_v2 = vld [vmem:[%s562_s2 + $0x18] sm:$0xff]  ;;  %v25_v4 = vld [vmem:[%s561_s1 + $0x8] sm:$0xff]  ;;  %v115_v5 = vld [vmem:[%s562_s2 + $0x10] sm:$0xff]  ;;  %354 = vmatprep.mubr.msk.f32.mxu0 %vm28_vm0, %v22_v3 }
   0x3   :  { %347 = vmatpush3.msra.mxu0 %v27_v0  ;;  %357 = vmatprep.subr.mxu1 %v116_v2  ;;  %v24_v6 = vld [vmem:[%s561_s1] sm:$0xff]  ;;  %v114_v7 = vld [vmem:[%s562_s2 + $0x8] sm:$0xff] }
   0x4   :  { %348 = vmatprep.subr.mxu0 %v26_v1  ;;  %358 = vmatpush3.msra.mxu1 %v116_v2 }
   0x5   :  { %349 = vmatpush3.msra.mxu0 %v26_v1 }
   0x6   :  { %13 = vsyncpa [#allocation5], 0  ;;  %350 = vmatprep.subr.mxu0 %v25_v4  ;;  %359 = vmatprep.subr.mxu1 %v115_v5  ;;  %v23_v8 = vld [vmem:[%s560_s0 + $0x8] sm:$0xff]  ;;  %v197_v9 = vld [vmem:[%s563_s3 + $0x18] sm:$0xff]  ;;  %vm110_vm1 = vcmask 130048   ;;  %s448_s22 = smov [#allocation2]  }
   0x7   :  { %351 = vmatpush3.msra.mxu0 %v25_v4  ;;  %360 = vmatpush3.msra.mxu1 %v115_v5  ;;  %v113_v10 = vld [vmem:[%s562_s2] sm:$0xff]  ;;  %v196_v11 = vld [vmem:[%s563_s3 + $0x10] sm:$0xff]  ;;  %v195_v12 = vld [vmem:[%s563_s3 + $0x8] sm:$0xff]  ;;  %s280_s23 = sshll.u32 %s448_s22, 4  ;;  %s449_s24 = smov [#allocation4]   ;;  %s281_s23 = int_to_ptr.vmem [resolvable:$true] %s280_s23 }
   0x8   :  { %352 = vmatprep.subr.mxu0 %v24_v6  ;;  %361 = vmatprep.subr.mxu1 %v114_v7  ;;  %v194_v13 = vld [vmem:[%s563_s3] sm:$0xff]  ;;  %s292_s3 = sshll.u32 %s449_s24, 4  ;;  %s384_s25 = scalar_lea.vmem %s281_s23, 256  ;;  %s293_s3 = int_to_ptr.vmem [resolvable:$true] %s292_s3 }
   0x9   :  { %353 = vmatpush3.msra.mxu0 %v24_v6  ;;  %362 = vmatpush3.msra.mxu1 %v114_v7  ;;  %p385_p0 = scmp.ne.s32.totalorder %s281_s23, %s384_s25  ;;  %p389_p1 = scmp.lt.s32.totalorder %s281_s23, %s281_s23 }
   0xa   :  { %355 = vmatmul.mubr.msk.f32.vlgmr.msra.gmra.mxu0 %vm28_vm0, %v23_v8  ;;  %368 = vmatprep.subr.mxu0 %v197_v9  ;;  %p390_p2 = scmp.lt.s32.totalorder %s384_s25, %s384_s25 }
   0xb   :  { %369 = vmatpush3.msra.mxu0 %v197_v9  ;;  %363 = vmatprep.subr.mxu1 %v113_v10 }
   0xc   :  { %370 = vmatprep.subr.mxu0 %v196_v11  ;;  %364 = vmatpush3.msra.mxu1 %v113_v10  ;;  %p391_p3 = por %p390_p2, %p389_p1 }
   0xd   :  { %371 = vmatpush3.msra.mxu0 %v196_v11  ;;  %365 = vmatprep.mubr.msk.f32.mxu1 %vm28_vm0, %v22_v3 }
   0xe   :  { %372 = vmatprep.subr.mxu0 %v195_v12  ;;  %366 = vmatmul.mubr.msk.f32.vlgmr.msra.gmra.mxu1 %vm28_vm0, %v23_v8  ;;  %p392_p4 = pnand %p391_p3, %p385_p0 }
   0xf   :  { %373 = vmatpush3.msra.mxu0 %v195_v12  ;;  %376 = vmatprep.mubr.msk.f32.mxu0 %vm28_vm0, %v22_v3 }
  0x10   :  { %374 = vmatprep.subr.mxu0 %v194_v13 }
  0x11   :  { %375 = vmatpush3.msra.mxu0 %v194_v13 }
  0x12   :  { %377 = vmatmul.mubr.msk.f32.vlgmr.msra.gmra.mxu0 %vm28_vm0, %v23_v8 }
  0xca   :  { %v356_v14 = vpop.f32.mrf.mxu0 }
  0xcb   :  { %112 = vst.msk [vmem:[#allocation2 + $0x8] sm:$0xff] %vm110_vm1, %v356_v14 }
  0xcc   :  { %v101_v15 = vpop.f32.mrf.mxu0 }
  0xcd   :  { %111 = vst.msk [vmem:[#allocation2] sm:$0xff] %vm110_vm1, %v101_v15 }
  0xce   :  { %v367_v16 = vpop.f32.mrf.mxu1 }
  0xcf   :  { %395 = shalt.err (!%p392_p4)
}
  0xd0   :  { %s450_s26 = smov 128   ;;  %s451_s27 = smov 8   ;;  %193 = vst.msk [vmem:[#allocation4 + $0x8] sm:$0xff] %vm110_vm1, %v367_v16  ;;  %v183_v17 = vpop.f32.mrf.mxu1 }
  0xd1   :  { %286 = dma.vmem_to_hbm [thread:$0]  %s281_s23, 256, %s564_s4, [#allocation3], %s450_s26, %s450_s26, %s451_s27   ;;  %192 = vst.msk [vmem:[#allocation4] sm:$0xff] %vm110_vm1, %v183_v17 }
  0xd2   :  { %s452_s30 = smov [#allocation6]   ;;  %v378_v18 = vpop.f32.mrf.mxu0  ;;  %s404_s8 = scalar_lea.vmem %s293_s3, 256 }
  0xd3   :  { %s304_s7 = sshll.u32 %s452_s30, 4  ;;  %p405_p5 = scmp.ne.s32.totalorder %s293_s3, %s404_s8  ;;  %s305_s7 = int_to_ptr.vmem [resolvable:$true] %s304_s7 }
  0xd4   :  { %p409_p6 = scmp.lt.s32.totalorder %s293_s3, %s293_s3  ;;  %p410_p7 = scmp.lt.s32.totalorder %s404_s8, %s404_s8 }
  0xd6   :  { %p411_p8 = por %p410_p7, %p409_p6 }
  0xd8   :  { %p412_p9 = pnand %p411_p8, %p405_p5 }
  0xda   :  { %415 = shalt.err (!%p412_p9)
}
  0xdb   :  { %298 = dma.vmem_to_hbm [thread:$0]  %s293_s3, 256, %s565_s5, [#allocation5], %s450_s26, %s450_s26, %s451_s27   ;;  %274 = vst.msk [vmem:[#allocation6 + $0x8] sm:$0xff] %vm110_vm1, %v378_v18  ;;  %v264_v19 = vpop.f32.mrf.mxu0 }
  0xdc   :  { %273 = vst.msk [vmem:[#allocation6] sm:$0xff] %vm110_vm1, %v264_v19  ;;  %s424_s10 = scalar_lea.vmem %s305_s7, 256  ;;  %p429_p11 = scmp.lt.s32.totalorder %s305_s7, %s305_s7 }
  0xdd   :  { %p425_p10 = scmp.ne.s32.totalorder %s305_s7, %s424_s10  ;;  %p430_p12 = scmp.lt.s32.totalorder %s424_s10, %s424_s10 }
  0xdf   :  { %p431_p13 = por %p430_p12, %p429_p11 }
  0xe1   :  { %p432_p0 = pnand %p431_p13, %p425_p10 }
  0xe3   :  { %435 = shalt.err (!%p432_p0)
}
  0xe4   :  { %310 = dma.vmem_to_hbm [thread:$0]  %s305_s7, 256, %s566_s6, [#allocation5], %s450_s26, %s450_s26, %s451_s27  }
  0xe5   :  { %444 = dma.done.wait [#allocation3], 256  }
  0xe6   :  { %445 = vsyncadd [#allocation3], 4294967040 }
  0xe7   :  { %446 = dma.done.wait [#allocation5], 512  }
  0xe8   :  { %447 = vsyncadd [#allocation5], 4294966784 }
  0xe9   :  { %320 = vsyncpa [#allocation3], 1 }
  0xea   :  { %321 = vsyncpa [#allocation5], 1 }

</bundles_post_ra>
